<compile_context>
chip_gen: v7x
topology: tpu7x:2x2x1
jax: 0.10.0
libtpu: 0.0.40
codegen_flags: <defaults>
</compile_context>

<pallas_src>
import math

import jax
import jax.numpy as jnp
from jax import lax
from jax.experimental import pallas as pl
from jax.experimental.pallas import tpu as pltpu


def _round_up(x: int, m: int) -> int:
    return ((x + m - 1) // m) * m


def _vmem_capacity_bytes() -> int:
    """Best-effort VMEM capacity query; assume the v7x worst case otherwise."""
    try:
        return int(pltpu.get_tpu_info().vmem_capacity_bytes)
    except Exception:
        return 64 * 1024 * 1024  # v7x: 64 MiB physical (v5e/v6e: 128 MiB)


def _choose_tile_n(n_tokens: int, row_bytes: int, requested, vmem_cap: int) -> int:
    """Pick the token-tile size.

    Preference order:
      * the double-buffered (tile_n, d_model) output blocks fit in ~40% of
        VMEM (headroom even on v7x's 64 MiB),
      * tile divides the 8-padded token count (no tile-granularity output
        padding -> no post-kernel slice copy of the result),
      * >= 2 grid steps so both v7x TensorCores get work via
        dimension_semantics=("parallel",)  (no-op on single-TC v5e/v6e).
    """
    n8 = _round_up(max(n_tokens, 1), 8)
    budget = max(1 << 20, int(vmem_cap * 0.4))          # output double-buffer budget
    cap = max(8, (min(budget // (2 * row_bytes), 1024) // 8) * 8)
    if requested is not None:
        cap = min(cap, max(8, _round_up(int(requested), 8)))
    cap = min(cap, n8)

    def largest_divisor(limit: int, min_steps: int):
        t = limit
        while t >= 8:
            if n8 % t == 0 and n8 // t >= min_steps:
                return t
            t -= 8
        return None

    if n8 <= cap:
        d = largest_divisor(n8, 2) if n8 >= 16 else None
        return d if d is not None else n8
    d = largest_divisor(cap, 2)
    if d is not None and d >= cap // 2:
        return d
    return cap  # accept tile-granularity padding + a post-kernel slice


def _make_dma_gather_kernel(tile_n: int, num_sems: int, scale: float):
    """Large-vocab path: LUT stays in HBM, rows are DMA-gathered into o_ref.

    Kernel args:
      ids_ref : (n_pad,) int32 token ids, resident in SMEM
      lut_hbm : (vocab, d_model) embedding table in HBM (memory_space=ANY)
      o_ref   : (tile_n, d_model) output block in VMEM (DMA destination)
      sem     : (num_sems,) DMA semaphore ring
    """
    num_chunks = tile_n // num_sems  # num_sems chosen to divide tile_n

    def kernel(ids_ref, lut_hbm, o_ref, sem):
        base = pl.multiple_of(pl.program_id(0) * tile_n, tile_n)

        def wait_slot(j):
            # Only shape + semaphore matter for a wait; row 0 is the template.
            pltpu.make_async_copy(lut_hbm.at[0], o_ref.at[0], sem.at[j]).wait()

        # Fill the DMA ring: first `num_sems` row copies (statically unrolled,
        # slot index is a compile-time constant -> no runtime modulo).
        for j in range(num_sems):
            tok = ids_ref[base + j]
            pltpu.make_async_copy(lut_hbm.at[tok], o_ref.at[j], sem.at[j]).start()

        # Steady state: one chunk of `num_sems` rows per iteration.  The id
        # for row r is read BEFORE the wait that recycles its slot (keeps the
        # SMEM scalar load off the post-wait critical path).
        if num_chunks > 1:
            @pl.loop(1, num_chunks)
            def _(c):
                rbase = pl.multiple_of(c * num_sems, num_sems)
                for j in range(num_sems):
                    r = rbase + j
                    tok = ids_ref[base + r]
                    wait_slot(j)
                    pltpu.make_async_copy(
                        lut_hbm.at[tok], o_ref.at[r], sem.at[j]
                    ).start()

        # Drain the ring.
        for j in range(num_sems):
            wait_slot(j)

        # Fused sqrt(d_model) scale, in place on the lane-dense output block.
        o_ref[...] = o_ref[...] * jnp.asarray(scale, dtype=o_ref.dtype)

    return kernel


def _make_onehot_kernel(vocab: int, scale: float):
    """Small-vocab fast path: LUT resident in VMEM, one-hot gather on the MXU.

    Kernel args:
      ids_ref : (tile_n, 1) int32 token ids in VMEM
      lut_ref : (vocab, d_model) embedding table, resident in VMEM
      o_ref   : (tile_n, d_model) output block in VMEM
    """
    def kernel(ids_ref, lut_ref, o_ref):
        ids = ids_ref[...]                                        # (tile_n, 1)
        iota = lax.broadcasted_iota(jnp.int32, (ids.shape[0], vocab), 1)
        onehot = (ids == iota).astype(lut_ref.dtype)              # (tile_n, vocab)
        acc = jnp.dot(onehot, lut_ref[...], preferred_element_type=jnp.float32)
        o_ref[...] = (acc * scale).astype(o_ref.dtype)

    return kernel


def embeddings_forward(x_ids: jax.Array, lut: jax.Array, *,
                       tile_n=None, mode: str = "auto") -> jax.Array:
    """Pallas equivalent of Embeddings.forward: lut[x] * sqrt(d_model).

    x_ids: integer token indices of any shape (e.g. (B, S)).
    lut:   (vocab, d_model) embedding table.
    returns x_ids.shape + (d_model,) in lut.dtype.
    mode:  "auto" | "dma" (HBM row gather) | "onehot" (VMEM-resident MXU path)
    """
    orig_shape = tuple(x_ids.shape)
    vocab, d_model = lut.shape
    n = math.prod(orig_shape) if orig_shape else 1
    scale = math.sqrt(d_model)
    itemsize = jnp.dtype(lut.dtype).itemsize
    row_bytes = d_model * itemsize
    lut_bytes = vocab * row_bytes
    vmem_cap = _vmem_capacity_bytes()

    # Clamp ids so an out-of-range token can never become an OOB DMA.
    ids_flat = jnp.clip(x_ids.reshape(-1).astype(jnp.int32), 0, vocab - 1)

    if mode == "auto":
        mode = "onehot" if (vocab <= 1024 and lut_bytes <= (4 << 20)) else "dma"

    if mode == "onehot":
        tn = _choose_tile_n(n, row_bytes, min(tile_n or 512, 512), vmem_cap)
        n_pad = _round_up(n, tn)
        ids_pad = ids_flat
        if n_pad != n:
            ids_pad = jnp.concatenate([ids_pad, jnp.zeros((n_pad - n,), jnp.int32)])
        ids_col = ids_pad.reshape(n_pad, 1)

        block_bytes = tn * d_model * itemsize
        onehot_bytes = tn * vocab * itemsize
        vmem_limit = int(min(vmem_cap * 3 // 4,
                             max(32 << 20,
                                 4 * block_bytes + 4 * lut_bytes
                                 + 2 * onehot_bytes + (8 << 20))))

        out_padded = pl.pallas_call(
            _make_onehot_kernel(vocab, scale),
            out_shape=jax.ShapeDtypeStruct((n_pad, d_model), lut.dtype),
            grid_spec=pltpu.PrefetchScalarGridSpec(
                num_scalar_prefetch=0,
                grid=(n_pad // tn,),
                in_specs=[
                    pl.BlockSpec((tn, 1), lambda i: (i, 0)),
                    # Constant index map -> LUT stays resident in VMEM.
                    pl.BlockSpec((vocab, d_model), lambda i: (0, 0)),
                ],
                out_specs=pl.BlockSpec((tn, d_model), lambda i: (i, 0)),
            ),
            compiler_params=pltpu.CompilerParams(
                dimension_semantics=("parallel",),
                vmem_limit_bytes=vmem_limit,
            ),
        )(ids_col, lut)
    else:
        tn = _choose_tile_n(n, row_bytes, tile_n, vmem_cap)
        n_pad = _round_up(n, tn)
        ids_pad = ids_flat
        if n_pad != n:
            # Padded slots gather row 0; sliced off below.
            ids_pad = jnp.concatenate([ids_pad, jnp.zeros((n_pad - n,), jnp.int32)])

        # Deep DMA ring; power of two that divides tile_n (slot index static).
        num_sems = 32 if tn % 32 == 0 else (16 if tn % 16 == 0 else 8)
        block_bytes = tn * d_model * itemsize
        vmem_limit = int(min(vmem_cap * 3 // 4,
                             max(32 << 20, 4 * block_bytes + (8 << 20))))

        out_padded = pl.pallas_call(
            _make_dma_gather_kernel(tn, num_sems, scale),
            out_shape=jax.ShapeDtypeStruct((n_pad, d_model), lut.dtype),
            grid_spec=pltpu.PrefetchScalarGridSpec(
                num_scalar_prefetch=0,
                grid=(n_pad // tn,),
                in_specs=[
                    # ids: whole array in SMEM (scalar DMA addresses; never
                    # used in an index_map, so no scalar prefetch needed).
                    pl.BlockSpec(memory_space=pltpu.MemorySpace.SMEM),
                    # Embedding table stays in HBM; rows are DMA-gathered.
                    pl.BlockSpec(memory_space=pl.ANY),
                ],
                out_specs=pl.BlockSpec((tn, d_model), lambda i: (i, 0)),
                scratch_shapes=[pltpu.SemaphoreType.DMA((num_sems,))],
            ),
            compiler_params=pltpu.CompilerParams(
                dimension_semantics=("parallel",),
                vmem_limit_bytes=vmem_limit,
            ),
        )(ids_pad, lut)

    out = out_padded if n_pad == n else out_padded[:n]
    return out.reshape(*orig_shape, d_model)


if __name__ == "__main__":
    # Small shapes consistent with the module; d_model a 128-multiple so the
    # output stores are lane-dense.
    batch, seq = 2, 8
    vocab, d_model = 512, 128

    key = jax.random.PRNGKey(0)
    k_lut, k_ids, k_ids2 = jax.random.split(key, 3)

    # nn.Embedding initializes weights ~ N(0, 1); reproduce deterministically.
    lut = jax.random.normal(k_lut, (vocab, d_model), dtype=jnp.float32)
    x = jax.random.randint(k_ids, (batch, seq), 0, vocab, dtype=jnp.int32)

    ref = lut[x] * math.sqrt(d_model)

    # 1) Auto path: small table -> VMEM-resident one-hot/MXU fast path.
    out_fast = jax.block_until_ready(embeddings_forward(x, lut))
    assert out_fast.shape == (batch, seq, d_model)
    assert jnp.allclose(out_fast, ref, atol=1e-4, rtol=1e-5)

    # 2) Forced HBM-resident DMA row-gather path (the large-vocab kernel).
    out_dma = jax.block_until_ready(embeddings_forward(x, lut, mode="dma"))
    assert jnp.allclose(out_dma, ref, atol=1e-4, rtol=1e-5)

    # 3) Ragged token count (exercises 8-padding + post-kernel slice), DMA path.
    x2 = jax.random.randint(k_ids2, (3, 5), 0, vocab, dtype=jnp.int32)
    ref2 = lut[x2] * math.sqrt(d_model)
    out2 = jax.block_until_ready(embeddings_forward(x2, lut, mode="dma"))
    assert out2.shape == (3, 5, d_model)
    assert jnp.allclose(out2, ref2, atol=1e-4, rtol=1e-5)

    print("KERNEL_OK")
</pallas_src>

<mosaic_0001>
module attributes {stable_mosaic.version = 11 : i64} {
  func.func @kernel(%arg0: i32, %arg1: memref<8x1xi32, #tpu.memory_space<vmem>>, %arg2: memref<512x128xf32, #tpu.memory_space<vmem>>, %arg3: memref<8x128xf32, #tpu.memory_space<vmem>>) attributes {dimension_semantics = [#tpu.dimension_semantics<parallel>], iteration_bounds = array<i64: 2>, scalar_prefetch = 0 : i64, scratch_operands = 0 : i64, tpu.core_type = #tpu.core_type<tc>, window_params = [{transform_indices = @transform_0, window_bounds = array<i64: 8, 1>}, {pipeline_mode = #tpu.pipeline_mode<synchronous>, transform_indices = @transform_1, window_bounds = array<i64: 512, 128>}, {transform_indices = @transform_2, window_bounds = array<i64: 8, 128>}]} {
    %c0 = arith.constant 0 : index
    %c0_0 = arith.constant 0 : index
    %0 = vector.load %arg1[%c0, %c0_0] : memref<8x1xi32, #tpu.memory_space<vmem>>, vector<8x1xi32>
    %1 = tpu.iota {dimensions = array<i32: 1>} : vector<8x512xi32>
    %2 = vector.broadcast %0 : vector<8x1xi32> to vector<8x512xi32>
    %3 = arith.cmpi eq, %2, %1 : vector<8x512xi32>
    %4 = arith.extui %3 : vector<8x512xi1> to vector<8x512xi32>
    %5 = arith.sitofp %4 : vector<8x512xi32> to vector<8x512xf32>
    %c0_1 = arith.constant 0 : index
    %c0_2 = arith.constant 0 : index
    %6 = vector.load %arg2[%c0_1, %c0_2] : memref<512x128xf32, #tpu.memory_space<vmem>>, vector<512x128xf32>
    %cst = arith.constant dense<0.000000e+00> : vector<8x128xf32>
    %7 = tpu.matmul %5, %6, %cst {dimension_numbers = #tpu.dot_dimension_numbers<[1], [0], [0], [1], [0, 0, 1, 1], [], []>} : vector<8x512xf32>, vector<512x128xf32>, vector<8x128xf32> -> vector<8x128xf32>
    %cst_3 = arith.constant 11.3137083 : f32
    %8 = vector.broadcast %cst_3 : f32 to vector<8x128xf32>
    %9 = arith.mulf %7, %8 : vector<8x128xf32>
    %c0_4 = arith.constant 0 : index
    %c0_5 = arith.constant 0 : index
    %10 = vector.load %arg3[%c0_4, %c0_5] : memref<8x128xf32, #tpu.memory_space<vmem>>, vector<8x128xf32>
    tpu.vector_store %arg3[%c0_4, %c0_5], %9 {strides = array<i32>} : memref<8x128xf32, #tpu.memory_space<vmem>>, vector<8x128xf32>,
    return
  }
  func.func @transform_0(%arg0: i32) -> (i32, i32) {
    %c0_i32 = arith.constant 0 : i32
    %c0_i32_0 = arith.constant 0 : i32
    return %arg0, %c0_i32 : i32, i32
  }
  func.func @transform_1(%arg0: i32) -> (i32, i32) {
    %c0_i32 = arith.constant 0 : i32
    %c0_i32_0 = arith.constant 0 : i32
    %c0_i32_1 = arith.constant 0 : i32
    return %c0_i32, %c0_i32_0 : i32, i32
  }
  func.func @transform_2(%arg0: i32) -> (i32, i32) {
    %c0_i32 = arith.constant 0 : i32
    %c0_i32_0 = arith.constant 0 : i32
    return %arg0, %c0_i32 : i32, i32
  }
}

</mosaic_0001>

<bundles_post_ra>
// kernel: tpu_custom_call.1
= control target key start
LH: loop header
LB: loop body
LE: loop exit
PB: predicated region body
PF: predicated region fallthrough
CT: control target
= control target key end

     0   :  { %7 = vsyncpa [#allocation3], 0  ;;  %s927_s0 = inlined_call_operand.vmem [shape: s32[16,1], index: 0, kind: input, shape index: {}]   ;;  %s928_s1 = inlined_call_operand.hbm [shape: f32[512,128], index: 1, kind: input, shape index: {}]   ;;  %s929_s2 = inlined_call_operand.hbm [shape: f32[16,128], index: 2, kind: output, shape index: {}]  }
   0x1   :  { %8 = vsyncpa [#allocation4], 0 }
   0x2   :  { %10 = vsyncpa [#allocation4 + $0x1], 0  ;;  %s792_s9 = smov 0   ;;  %s794_s10 = smov 0  }
   0x3   :  { %s796_s11 = smov 0   ;;  %s798_s12 = smov 0  }
   0x4 LB: > { %s813_s13 = sadd.s32 4294967295, %s769_s12   ;;  %s466_s14 = sadd.s32 4294967294, %s769_s12   ;;  %s769_s12 = sphi %s798_s12, %s945_s12   ;;  %s765_s11 = sphi %s796_s11, %s944_s11   ;;  %s761_s10 = sphi %s794_s10, %s943_s10   ;;  %s757_s9 = sphi %s792_s9, %s942_s9  }
   0x5   : > { %s817_s15 = sadd.s32 1, %s769_s12   ;;  %s70_s16 = sadd.s32 1, %s765_s11 }
   0x6   : > { %s67_s17 = ssub.s32 %s769_s12, %s817_s15  ;;  %p80_p0 = scmp.ne.s32.totalorder %s765_s11, %s761_s10 }
   0x7   : > { %p68_p1 = scmp.eq.s32.totalorder %s67_s17, 0  ;;  %p81_p2 = scmp.eq.s32.totalorder %s813_s13, 1 }
   0x8   : > { %p86_p3 = scmp.ne.s32.totalorder %s761_s10, %s757_s9  ;;  %p87_p4 = scmp.eq.s32.totalorder %s466_s14, 1 }
   0x9   : > { %s828_s18 = scalar_select %p68_p1, %s765_s11, %s70_s16  }
   0xa   : > { %p830_p5 = por %p81_p2, %p80_p0  ;;  %p834_p6 = por %p87_p4, %p86_p3 }
   0xb   : > { %p467_p7 = scmp.ge.s32.totalorder %s769_s12, 1  ;;  %p94_p8 = scmp.lt.s32.totalorder %s769_s12, 3 }
   0xc   : > { %s933_s19 = scalar_select %p830_p5, 1, 0 }
   0xd   : > { %s934_s20 = scalar_select %p834_p6, 1, 0 }
   0xe   : > { %p930_p9 = scmp.eq.s32.totalorder %s813_s13, 0  ;;  %p841_p10 = pnand %p467_p7, %p94_p8 }
   0xf   : > { %s771_s22 = smov [#allocation2]   ;;  %s675_s27 = scalar_lea.hbm %s928_s1, 8192 }
  0x10   : > { %s935_s21 = scalar_select %p841_p10, 1, 0 }
  0x11   : > { %s106_s23 = sshll.u32 %s771_s22, 4  ;;  %p626_p11 = pneg %p841_p10  ;;  %s107_s23 = int_to_ptr.vmem [resolvable:$true] %s106_s23 }
  0x12   : > { %p676_p13 = scmp.ne.s32.totalorder %s928_s1, %s675_s27  ;;  %p682_p3 = scmp.lt.u32.totalorder %s675_s27, %s928_s1 }
  0x13   : > { %p849_p12 = pnand %p930_p9, %p626_p11 }
  0x15   : > { %p677_p0 = pneg %p849_p12 }
  0x17   : > { %p678_p1 = pnand %p677_p0, %p676_p13 }
  0x19   : > { %p679_p2 = pneg %p678_p1 }
  0x1b   : > { %p684_p4 = pnand %p682_p3, %p679_p2 }
  0x1d   : > { %687 = shalt.err (!%p684_p4)
}
  0x1e   : > { %s688_s4 = scalar_lea.vmem %s107_s23, 8192  ;;  %p696_p9 = scmp.lt.s32.totalorder %s107_s23, %s107_s23 }
  0x1f   : > { %p689_p7 = scmp.ne.s32.totalorder %s107_s23, %s688_s4  ;;  %p697_p6 = scmp.lt.s32.totalorder %s688_s4, %s688_s4 }
  0x21   : > { %p691_p8 = pnand %p689_p7, %p677_p0  ;;  %p698_p5 = por %p697_p6, %p696_p9 }
  0x23   : > { %p692_p11 = pneg %p691_p8 }
  0x25   : > { %p699_p10 = pnand %p698_p5, %p692_p11 }
  0x27   : > { %702 = shalt.err (!%p699_p10)
}
  0x28   : > { %s772_s5 = smov 128   ;;  %s773_s6 = smov 8  }
  0x29   : > { %629 = dma.hbm_to_vmem [thread:$0]  (!%p849_p12), %s928_s1, 8192, %s107_s23, [#allocation3], %s772_s5, %s772_s5, %s773_s6  }
  0x2a   : > { %p937_p13 = scmp.ne.s32.totalorder %s935_s21, 0 }
  0x2b   : > { %p938_p1 = scmp.eq.s32.totalorder (!%p937_p13), %s813_s13, 0 }
  0x2c   : > { %129 = sbr.rel (%p937_p13) target bundleno = 422 (0x1a6), region = 28 }
  0x33   : > { %748 = dma.done.wait (%p938_p1), [#allocation3], 8192   ;;  %p939_p0 = pmov %p938_p1 }
  0x34   : > { %p150_p5 = scmp.lt.s32.totalorder %s813_s13, 1  ;;  %v774_v0 = vmov 0   ;;  %v191_v2 = vld [vmem:[#allocation2 + $0x80] sm:$0xff]  ;;  %v192_v3 = vld [vmem:[#allocation2 + $0x88] sm:$0xff]  ;;  %v193_v14 = vld [vmem:[#allocation2 + $0x90] sm:$0xff]  ;;  %s147_s21 = sand.u32 1, %s761_s10  }
  0x35   : > { %750 = vsyncadd (%p939_p0), [#allocation3], 4294959104  ;;  %674 = vset.pattern.permute.xlu0 %v774_v0  ;;  %v556_v4 = vpack.c.bf16 %v192_v3, %v191_v2  ;;  %v223_v5 = vld [vmem:[#allocation2 + $0x180] sm:$0xff]  ;;  %v224_v6 = vld [vmem:[#allocation2 + $0x188] sm:$0xff]  ;;  %s472_s24 = sshll.u32 %s147_s21, 3  ;;  %s483_s25 = sshll.u32 %s813_s13, 7 }
  0x36   : > { %s151_s14 = scalar_select %p150_p5, %s813_s13, 1  ;;  %v175_v7 = vld [vmem:[#allocation2] sm:$0xff]  ;;  %v588_v8 = vpack.c.bf16 %v224_v6, %v223_v5  ;;  %v176_v9 = vld [vmem:[#allocation2 + $0x8] sm:$0xff]  ;;  %v194_v15 = vld [vmem:[#allocation2 + $0x98] sm:$0xff] }
  0x37   : > { %v207_v10 = vld [vmem:[#allocation2 + $0x100] sm:$0xff]  ;;  %v208_v11 = vld [vmem:[#allocation2 + $0x108] sm:$0xff]  ;;  %557 = vmatprep.subr.bf16.mxu0 %v556_v4  ;;  %v558_v12 = vpack.c.bf16 %v176_v9, %v175_v7  ;;  %v225_v16 = vld [vmem:[#allocation2 + $0x190] sm:$0xff]  ;;  %v560_v17 = vpack.c.bf16 %v194_v15, %v193_v14  ;;  %s149_s26 = scalar_lea.vmem [#allocation5], %s472_s24  ;;  %s885_s30 = scalar_lea.hbm %s929_s2, %s483_s25 }
  0x38   : > { %s473_s16 = sshll.u32 %s151_s14, 3  ;;  %v590_v13 = vpack.c.bf16 %v208_v11, %v207_v10  ;;  %589 = vmatprep.subr.bf16.mxu1 %v588_v8  ;;  %v226_v18 = vld [vmem:[#allocation2 + $0x198] sm:$0xff]  ;;  %v177_v19 = vld [vmem:[#allocation2 + $0x10] sm:$0xff]  ;;  %v195_v25 = vld [vmem:[#allocation2 + $0xa0] sm:$0xff]  ;;  %s395_s27 = sshll.u32 %s149_s26, 4  ;;  %s887_s27 = int_to_ptr.vmem [resolvable:$true] %s395_s27 }
  0x39   : > { %s153_s23 = scalar_lea.vmem %s927_s0, %s473_s16  ;;  %v178_v20 = vld [vmem:[#allocation2 + $0x18] sm:$0xff]  ;;  %559 = vmatpush3.bf16.msra.mxu0 %v558_v12  ;;  %v592_v21 = vpack.c.bf16 %v226_v18, %v225_v16  ;;  %v209_v23 = vld [vmem:[#allocation2 + $0x110] sm:$0xff]  ;;  %v196_v27 = vld [vmem:[#allocation2 + $0xa8] sm:$0xff]  ;;  %s382_s3 = scalar_lea.sflag [#allocation4], %s147_s21 }
  0x3a   : > { %v154_v1 = vld [vmem:[%s153_s23] sm:$0xff]  ;;  %591 = vmatpush3.bf16.msra.mxu1 %v590_v13  ;;  %v562_v22 = vpack.c.bf16 %v178_v20, %v177_v19  ;;  %v210_v24 = vld [vmem:[#allocation2 + $0x118] sm:$0xff]  ;;  %561 = vmatprep.subr.bf16.mxu0 %v560_v17  ;;  %v228_v29 = vld [vmem:[#allocation2 + $0x1a8] sm:$0xff]  ;;  %v564_v30 = vpack.c.bf16 %v196_v27, %v195_v25  ;;  %s703_s4 = scalar_lea.vmem %s887_s27, 128  ;;  %p940_p9 = scmp.ne.s32.totalorder %s933_s19, 0 }
  0x3b   : > { %161 = vperm.xlu0 %674, %v154_v1   ;;  %v594_v26 = vpack.c.bf16 %v210_v24, %v209_v23  ;;  %v227_v28 = vld [vmem:[#allocation2 + $0x1a0] sm:$0xff]  ;;  %593 = vmatprep.subr.bf16.mxu1 %v592_v21  ;;  %v180_v33 = vld [vmem:[#allocation2 + $0x28] sm:$0xff]  ;;  %v197_v36 = vld [vmem:[#allocation2 + $0xb0] sm:$0xff]  ;;  %p704_p6 = scmp.ne.s32.totalorder %s887_s27, %s703_s4  ;;  %s776_s13 = smov [#allocation5]  }
  0x3c   : > { %v596_v31 = vpack.c.bf16 %v228_v29, %v227_v28  ;;  %v179_v32 = vld [vmem:[#allocation2 + $0x20] sm:$0xff]  ;;  %v212_v35 = vld [vmem:[#allocation2 + $0x128] sm:$0xff]  ;;  %v198_v37 = vld [vmem:[#allocation2 + $0xb8] sm:$0xff]  ;;  %s707_s5 = sshll.u32 %s776_s13, 4  ;;  %s708_s5 = int_to_ptr.vmem [resolvable:$false] %s707_s5 }
  0x3d   : > { %v211_v34 = vld [vmem:[#allocation2 + $0x120] sm:$0xff]  ;;  %563 = vmatpush3.bf16.msra.mxu0 %v562_v22  ;;  %v566_v38 = vpack.c.bf16 %v180_v33, %v179_v32  ;;  %v229_v40 = vld [vmem:[#allocation2 + $0x1b0] sm:$0xff]  ;;  %v230_v41 = vld [vmem:[#allocation2 + $0x1b8] sm:$0xff]  ;;  %v568_v43 = vpack.c.bf16 %v198_v37, %v197_v36  ;;  %p705_p10 = pnand %p704_p6, %p940_p9  ;;  %s709_s6 = scalar_lea.vmem %s708_s5, 256 }
  0x3e   : > { %595 = vmatpush3.bf16.msra.mxu1 %v594_v26  ;;  %v598_v39 = vpack.c.bf16 %v212_v35, %v211_v34  ;;  %v181_v42 = vld [vmem:[#allocation2 + $0x30] sm:$0xff]  ;;  %565 = vmatprep.subr.bf16.mxu0 %v564_v30  ;;  %v600_v44 = vpack.c.bf16 %v230_v41, %v229_v40  ;;  %v182_v45 = vld [vmem:[#allocation2 + $0x38] sm:$0xff]  ;;  %v199_v48 = vld [vmem:[#allocation2 + $0xc0] sm:$0xff]  ;;  %v155_v34 = vlaneseq  ;;  %v775_v40 = vmov 1.0   ;;  %p710_p2 = scmp.lt.s32.totalorder %s887_s27, %s708_s5  ;;  %p711_p3 = scmp.lt.s32.totalorder %s709_s6, %s703_s4 }
  0x3f   : > { %597 = vmatprep.subr.bf16.mxu1 %v596_v31  ;;  %v213_v46 = vld [vmem:[#allocation2 + $0x130] sm:$0xff]  ;;  %v214_v47 = vld [vmem:[#allocation2 + $0x138] sm:$0xff]  ;;  %v200_v49 = vld [vmem:[#allocation2 + $0xc8] sm:$0xff]  ;;  %v570_v52 = vpack.c.bf16 %v182_v45, %v181_v42  ;;  %p706_p12 = pneg %p705_p10 }
  0x40   : > { %v231_v50 = vld [vmem:[#allocation2 + $0x1c0] sm:$0xff]  ;;  %v232_v51 = vld [vmem:[#allocation2 + $0x1c8] sm:$0xff]  ;;  %v602_v53 = vpack.c.bf16 %v214_v47, %v213_v46  ;;  %v572_v56 = vpack.c.bf16 %v200_v49, %v199_v48  ;;  %v201_v60 = vld [vmem:[#allocation2 + $0xd0] sm:$0xff]  ;;  %v156_v35 = vand.u32 127, %v155_v34  ;;  %p712_p4 = por %p711_p3, %p710_p2 }
  0x41   : > { %567 = vmatpush3.bf16.msra.mxu0 %v566_v38  ;;  %v183_v54 = vld [vmem:[#allocation2 + $0x40] sm:$0xff]  ;;  %v184_v55 = vld [vmem:[#allocation2 + $0x48] sm:$0xff]  ;;  %v604_v57 = vpack.c.bf16 %v232_v51, %v231_v50  ;;  %v202_v61 = vld [vmem:[#allocation2 + $0xd8] sm:$0xff] }
  0x42   : > { %599 = vmatpush3.bf16.msra.mxu1 %v598_v39  ;;  %569 = vmatprep.subr.bf16.mxu0 %v568_v43  ;;  %v215_v58 = vld [vmem:[#allocation2 + $0x140] sm:$0xff]  ;;  %v216_v59 = vld [vmem:[#allocation2 + $0x148] sm:$0xff]  ;;  %v233_v62 = vld [vmem:[#allocation2 + $0x1d0] sm:$0xff]  ;;  %v574_v0 = vpack.c.bf16 %v184_v55, %v183_v54  ;;  %v576_v4 = vpack.c.bf16 %v202_v61, %v201_v60  ;;  %v157_v36 = vadd.s32 128, %v156_v35  ;;  %v159_v37 = vadd.s32 384, %v156_v35  ;;  %p713_p7 = pnand %p712_p4, %p706_p12 }
  0x43   : > { %601 = vmatprep.subr.bf16.mxu1 %v600_v44  ;;  %v234_v63 = vld [vmem:[#allocation2 + $0x1d8] sm:$0xff]  ;;  %v606_v1 = vpack.c.bf16 %v216_v59, %v215_v58  ;;  %v185_v2 = vld [vmem:[#allocation2 + $0x50] sm:$0xff]  ;;  %v203_v8 = vld [vmem:[#allocation2 + $0xe0] sm:$0xff]  ;;  %v158_v38 = vadd.s32 256, %v156_v35 }
  0x44   : > { %v186_v3 = vld [vmem:[#allocation2 + $0x58] sm:$0xff]  ;;  %v608_v5 = vpack.c.bf16 %v234_v63, %v233_v62  ;;  %v217_v6 = vld [vmem:[#allocation2 + $0x150] sm:$0xff]  ;;  %v204_v9 = vld [vmem:[#allocation2 + $0xe8] sm:$0xff] }
  0x45   : > { %571 = vmatpush3.bf16.msra.mxu0 %v570_v52  ;;  %v218_v7 = vld [vmem:[#allocation2 + $0x158] sm:$0xff]  ;;  %v235_v10 = vld [vmem:[#allocation2 + $0x1e0] sm:$0xff]  ;;  %v236_v11 = vld [vmem:[#allocation2 + $0x1e8] sm:$0xff]  ;;  %v578_v12 = vpack.c.bf16 %v186_v3, %v185_v2  ;;  %v580_v16 = vpack.c.bf16 %v204_v9, %v203_v8 }
  0x46   : > { %603 = vmatpush3.bf16.msra.mxu1 %v602_v53  ;;  %573 = vmatprep.subr.bf16.mxu0 %v572_v56  ;;  %v610_v13 = vpack.c.bf16 %v218_v7, %v217_v6  ;;  %v187_v14 = vld [vmem:[#allocation2 + $0x60] sm:$0xff]  ;;  %v188_v15 = vld [vmem:[#allocation2 + $0x68] sm:$0xff]  ;;  %v612_v17 = vpack.c.bf16 %v236_v11, %v235_v10  ;;  %v205_v20 = vld [vmem:[#allocation2 + $0xf0] sm:$0xff] }
  0x47   : > { %605 = vmatprep.subr.bf16.mxu1 %v604_v57  ;;  %v219_v18 = vld [vmem:[#allocation2 + $0x160] sm:$0xff]  ;;  %v220_v19 = vld [vmem:[#allocation2 + $0x168] sm:$0xff]  ;;  %v206_v21 = vld [vmem:[#allocation2 + $0xf8] sm:$0xff]  ;;  %v582_v24 = vpack.c.bf16 %v188_v15, %v187_v14 }
  0x48   : > { %v237_v22 = vld [vmem:[#allocation2 + $0x1f0] sm:$0xff]  ;;  %v238_v23 = vld [vmem:[#allocation2 + $0x1f8] sm:$0xff]  ;;  %v614_v25 = vpack.c.bf16 %v220_v19, %v219_v18  ;;  %v584_v27 = vpack.c.bf16 %v206_v21, %v205_v20 }
  0x49   : > { %575 = vmatpush3.bf16.msra.mxu0 %v574_v0  ;;  %v189_v26 = vld [vmem:[#allocation2 + $0x70] sm:$0xff]  ;;  %v616_v28 = vpack.c.bf16 %v238_v23, %v237_v22  ;;  %v190_v29 = vld [vmem:[#allocation2 + $0x78] sm:$0xff] }
  0x4a   : > { %607 = vmatpush3.bf16.msra.mxu1 %v606_v1  ;;  %577 = vmatprep.subr.bf16.mxu0 %v576_v4  ;;  %v221_v30 = vld [vmem:[#allocation2 + $0x170] sm:$0xff]  ;;  %v222_v31 = vld [vmem:[#allocation2 + $0x178] sm:$0xff]  ;;  %v586_v32 = vpack.c.bf16 %v190_v29, %v189_v26 }
  0x4b   : > { %609 = vmatprep.subr.bf16.mxu1 %v608_v5  ;;  %v618_v33 = vpack.c.bf16 %v222_v31, %v221_v30 }
  0x4d   : > { %579 = vmatpush3.bf16.msra.mxu0 %v578_v12 }
  0x4e   : > { %611 = vmatpush3.bf16.msra.mxu1 %v610_v13  ;;  %581 = vmatprep.subr.bf16.mxu0 %v580_v16 }
  0x4f   : > { %613 = vmatprep.subr.bf16.mxu1 %v612_v17 }
  0x51   : > { %583 = vmatpush3.bf16.msra.mxu0 %v582_v24 }
  0x52   : > { %615 = vmatpush3.bf16.msra.mxu1 %v614_v25  ;;  %585 = vmatprep.subr.bf16.mxu0 %v584_v27 }
  0x53   : > { %617 = vmatprep.subr.bf16.mxu1 %v616_v28 }
  0x55   : > { %587 = vmatpush3.bf16.msra.mxu0 %v586_v32 }
  0x56   : > { %619 = vmatpush3.bf16.msra.mxu1 %v618_v33 }
  0xba   : > { %v162_v39 = vpop.permute.xlu0 %161 }
  0xbb   : > { %vm164_vm0 = vcmp.eq.s32.totalorder %v162_v39, %v157_v36  ;;  %vm166_vm1 = vcmp.eq.s32.totalorder %v162_v39, %v159_v37  ;;  %vm163_vm2 = vcmp.eq.s32.totalorder %v162_v39, %v156_v35  ;;  %vm165_vm3 = vcmp.eq.s32.totalorder %v162_v39, %v158_v38 }
  0xbc   : > { %478 = vmatprep.mubr.msk.f32.mxu0 %vm164_vm0, %v775_v40  ;;  %480 = vmatprep.mubr.msk.f32.mxu1 %vm166_vm1, %v775_v40 }
  0xbd   : > { %479 = vmatmul.mubr.msk.f32.vlgmr.msra.gmra.mrb[0].mxu0 %vm163_vm2, %v775_v40  ;;  %481 = vmatmul.mubr.msk.f32.vlgmr.msra.gmra.mrb[0].mxu1 %vm165_vm3, %v775_v40 }
 0x190   : > { %v518_v41 = vpop.f32.mrb[0].mxu0  ;;  %v553_v42 = vpop.f32.mrb[0].mxu1 }
 0x191   : > { %v519_v43 = vpop.f32.mrb[1].mxu0  ;;  %v554_v44 = vpop.f32.mrb[1].mxu1 }
 0x192   : > { %v520_v45 = vadd.f32 %v519_v43, %v518_v41  ;;  %v555_v46 = vadd.f32 %v554_v44, %v553_v42 }
 0x194   : > { %v376_v47 = vadd.f32 %v555_v46, %v520_v45 }
 0x196   : > { %v379_v48 = vmul.f32 11.313708, %v376_v47 }
 0x198   : > { %380 = vst [vmem:[%s149_s26] sm:$0xff] %v379_v48 }
 0x199   : > { %716 = shalt.err (!%p713_p7)
}
 0x19a   : > { %s717_s7 = scalar_lea.hbm %s885_s30, 128  ;;  %s721_s16 = scalar_lea.hbm %s929_s2, 256 }
 0x19b   : > { %p718_p8 = scmp.ne.s32.totalorder %s885_s30, %s717_s7  ;;  %p722_p1 = scmp.lt.u32.totalorder %s885_s30, %s929_s2 }
 0x19c   : > { %p723_p0 = scmp.lt.u32.totalorder %s721_s16, %s717_s7  ;;  %p725_p6 = scmp.lt.u32.totalorder %s717_s7, %s885_s30 }
 0x19d   : > { %p719_p11 = pnand %p718_p8, %p940_p9 }
 0x19e   : > { %p724_p5 = por %p723_p0, %p722_p1 }
 0x19f   : > { %p720_p13 = pneg %p719_p11 }
 0x1a0   : > { %p726_p10 = por %p725_p6, %p724_p5 }
 0x1a2   : > { %p727_p12 = pnand %p726_p10, %p720_p13 }
 0x1a4   : > { %730 = shalt.err (!%p727_p12)
}
 0x1a5   : > { %624 = dma.vmem_to_hbm [thread:$0]  (%p940_p9), %s887_s27, 128, %s885_s30, %s382_s3  }
 0x1a6 PF: > { %p636_p2 = scmp.ge.s32.totalorder %s769_s12, 2  ;;  %s407_s23 = sand.u32 1, %s757_s9  }
 0x1a7   : > { %p941_p3 = scmp.ne.s32.totalorder %s934_s20, 0  ;;  %s408_s21 = scalar_lea.sflag [#allocation4], %s407_s23 }
 0x1a9   : > { %p631_p4 = pnand %p636_p2, %p941_p3 }
 0x1ab   : > { %752 = dma.done.wait (!%p631_p4), %s408_s21, 128  }
 0x1ac   : > { %754 = vsyncadd (!%p631_p4), %s408_s21, 4294967168  ;;  %p13_p7 = scmp.ge.s32.totalorder %s817_s15, 4   ;;  %s942_s9 = smov %s761_s10 }
 0x1ad   : > { %s943_s10 = smov %s765_s11  ;;  %s944_s11 = smov %s828_s18 }
 0x1ae   : > { %s945_s12 = smov %s817_s15  ;;  %15 = sbr.rel (!%p13_p7) target bundleno = 4 (0x4), region = 68 }
 0x1b5   :  { %413 = vsyncpa [#allocation3], 1 }
 0x1b6   :  { %415 = vsyncpa [#allocation3 + $0x1], 1 }
 0x1b7   :  { %416 = vsyncpa [#allocation4], 1 }
 0x1b8   :  { %418 = vsyncpa [#allocation4 + $0x1], 1 }

</bundles_post_ra>
